<compile_context>
chip_gen: v6e
topology: v6e:2x2x1
jax: 0.10.0
libtpu: 0.0.40
codegen_flags: <defaults>
</compile_context>

<pallas_src>
import functools

import jax
import jax.numpy as jnp
from jax import lax
from jax.experimental import pallas as pl
from jax.experimental.pallas import tpu as pltpu

MAX_PIX_TILE = 4096            # lane-dim pixels per grid step (multiple of 128)
VMEM_LIMIT = 32 * 1024 * 1024  # explicit scoped-VMEM limit (portable v5e/v6e/v7x)


def _pick_tile(n_pix, max_tile=MAX_PIX_TILE):
    """Largest multiple of 128 that divides n_pix and is <= max_tile."""
    assert n_pix % 128 == 0, "H*W must be a multiple of 128"
    t = min(max_tile, n_pix)
    while n_pix % t != 0:
        t -= 128
    return t


# ----------------------------------------------------------------------------
# Kernel 1: batched flow network (stands in for the checkpointed PoseNet flow
# head) fused with flow->depth + validity.  Packed output per pair:
#   rows [0:2]=flow, [2]=confidence, [3]=scaled depth, [4]=valid, [5:8]=pad.
# ----------------------------------------------------------------------------
def _flow_net_kernel(a_ref, b_ref, w1a_ref, w1b_ref, b1_ref, w23_ref, b23_ref,
                     out_ref, *, baseline_scaled, dmin_scaled):
    a = a_ref[...].astype(jnp.float32)                         # (3, Pt)
    b = b_ref[...].astype(jnp.float32)                         # (3, Pt)
    # First layer split per image: avoids any 6xP concat in HBM.
    h = (jnp.dot(w1a_ref[...], a, preferred_element_type=jnp.float32)
         + jnp.dot(w1b_ref[...], b, preferred_element_type=jnp.float32)
         + b1_ref[...])
    h = jnp.maximum(h, 0.0)                                    # (32, Pt)
    # Fused flow + confidence head: one (3, hid) matmul.
    fc = jnp.dot(w23_ref[...], h, preferred_element_type=jnp.float32) + b23_ref[...]

    flow = fc[0:2, :]
    conf = jax.nn.sigmoid(fc[2:3, :])

    # flow -> depth : depth = (baseline * scale) / disparity, valid inside the
    # scaled depth-clipping range (dmin*scale, 1.0].
    disp = jnp.abs(fc[0:1, :]) + 1e-2
    depth = baseline_scaled / disp
    valid = jnp.where((depth >= dmin_scaled) & (depth <= 1.0), 1.0, 0.0)

    pad = jnp.zeros_like(fc)                                   # (3, Pt)
    out_ref[...] = jnp.concatenate([flow, conf, depth, valid, pad], axis=0)


@functools.partial(jax.jit, static_argnames=("baseline_scaled", "dmin_scaled"))
def flow_net_batched(img_a, img_b, params, *, baseline_scaled, dmin_scaled):
    """img_a, img_b: (N, 3, P) bf16 image pairs -> packed (N, 8, P) f32."""
    n_pairs, _, n_pix = img_a.shape
    tile = _pick_tile(n_pix)
    kernel = functools.partial(_flow_net_kernel,
                               baseline_scaled=float(baseline_scaled),
                               dmin_scaled=float(dmin_scaled))

    img_spec = pl.BlockSpec((None, 3, tile), lambda n, i: (n, 0, i))

    def full(shape):
        return pl.BlockSpec(shape, lambda n, i: (0, 0))

    return pl.pallas_call(
        kernel,
        out_shape=jax.ShapeDtypeStruct((n_pairs, 8, n_pix), jnp.float32),
        grid_spec=pltpu.PrefetchScalarGridSpec(
            num_scalar_prefetch=0,
            grid=(n_pairs, n_pix // tile),
            in_specs=[img_spec, img_spec,
                      full(params["w1a"].shape), full(params["w1b"].shape),
                      full(params["b1"].shape),
                      full(params["w23"].shape), full(params["b23"].shape)],
            out_specs=pl.BlockSpec((None, 8, tile), lambda n, i: (n, 0, i)),
        ),
        compiler_params=pltpu.CompilerParams(
            dimension_semantics=("parallel", "parallel"),
            vmem_limit_bytes=VMEM_LIMIT),
    )(img_a, img_b, params["w1a"], params["w1b"], params["b1"],
      params["w23"], params["b23"])


# ----------------------------------------------------------------------------
# Kernel 2: weighted Gauss-Newton normal equations.
# Inputs: flow (2,P), scaled depth z (1,P), weights w (1,P).
# Output: augmented (8,8) matrix with [:6,:6] = J^T W J and [:6,6] = J^T W r.
# ----------------------------------------------------------------------------
def _normal_eq_kernel(flow_ref, z_ref, w_ref, out_ref, acc_ref,
                      *, fx, fy, cx, cy, width, tile, steps_per_split):
    c = pl.program_id(0)   # parallel split (both TensorCores on v7x)
    i = pl.program_id(1)   # pixel-tile reduction axis

    @pl.when(i == 0)
    def _():
        acc_ref[...] = jnp.zeros_like(acc_ref)

    # Recompute pixel coordinates from the linear pixel index (no u/v HBM rows).
    start = (c * steps_per_split + i) * tile
    lin = (lax.broadcasted_iota(jnp.int32, (1, tile), 1) + start).astype(jnp.float32)
    v = jnp.floor(lin / float(width))
    u = lin - v * float(width)

    flow = flow_ref[...]                                       # (2, Pt)
    ru = flow[0:1, :]
    rv = flow[1:2, :]
    z = jnp.maximum(z_ref[...], 1e-6)                          # (1, Pt)
    w = w_ref[...]                                             # (1, Pt)

    iz = 1.0 / z
    x = (u - cx) * z * (1.0 / fx)
    y = (v - cy) * z * (1.0 / fy)
    xz = x * iz
    yz = y * iz
    zero = jnp.zeros_like(u)

    # Augmented 8-row Jacobians: rows 0..5 = pinhole projection Jacobian wrt
    # se3 [tx,ty,tz,wx,wy,wz], row 6 = residual, row 7 = 0.  A single pair of
    # MXU dots then yields both J^T W J (top-left 6x6) and J^T W r (column 6).
    ju = jnp.concatenate(
        [fx * iz, zero, -fx * xz * iz,
         -fx * xz * yz, fx * (1.0 + xz * xz), -fx * yz,
         ru, zero], axis=0)                                    # (8, Pt)
    jv = jnp.concatenate(
        [zero, fy * iz, -fy * yz * iz,
         -fy * (1.0 + yz * yz), fy * xz * yz, fy * xz,
         rv, zero], axis=0)                                    # (8, Pt)

    dn = (((1,), (1,)), ((), ()))                              # contract over pixels
    acc_ref[...] += (lax.dot_general(w * ju, ju, dn, preferred_element_type=jnp.float32)
                     + lax.dot_general(w * jv, jv, dn, preferred_element_type=jnp.float32))

    @pl.when(i == pl.num_programs(1) - 1)
    def _():
        out_ref[...] = acc_ref[...]


def pose_normal_equations(flow, z, w, *, fx, fy, cx, cy, width):
    _, n_pix = flow.shape
    tile = _pick_tile(n_pix)
    steps = n_pix // tile
    splits = 2 if steps % 2 == 0 else 1        # 2-way parallel split (v7x megacore)
    steps_per_split = steps // splits
    kernel = functools.partial(_normal_eq_kernel, fx=float(fx), fy=float(fy),
                               cx=float(cx), cy=float(cy), width=int(width),
                               tile=tile, steps_per_split=steps_per_split)

    def pix_map(c, i):
        return (0, c * steps_per_split + i)

    partials = pl.pallas_call(
        kernel,
        out_shape=jax.ShapeDtypeStruct((splits, 8, 8), jnp.float32),
        grid_spec=pltpu.PrefetchScalarGridSpec(
            num_scalar_prefetch=0,
            grid=(splits, steps_per_split),
            in_specs=[pl.BlockSpec((2, tile), pix_map),
                      pl.BlockSpec((1, tile), pix_map),
                      pl.BlockSpec((1, tile), pix_map)],
            out_specs=pl.BlockSpec((None, 8, 8), lambda c, i: (c, 0, 0)),
            scratch_shapes=[pltpu.VMEM((8, 8), jnp.float32)],
        ),
        compiler_params=pltpu.CompilerParams(
            dimension_semantics=("parallel", "arbitrary"),
            vmem_limit_bytes=VMEM_LIMIT),
    )(flow, z, w)
    return jnp.sum(partials, axis=0)            # (8, 8) combined A | b


# ----------------------------------------------------------------------------
# SE3 glue (small, not a hot path).
# ----------------------------------------------------------------------------
def se3_exp(xi):
    v, w = xi[:3], xi[3:]
    th = jnp.linalg.norm(w) + 1e-12
    K = jnp.array([[0.0, -w[2], w[1]],
                   [w[2], 0.0, -w[0]],
                   [-w[1], w[0], 0.0]], dtype=xi.dtype)
    a = jnp.sin(th) / th
    b = (1.0 - jnp.cos(th)) / (th * th)
    c = (1.0 - a) / (th * th)
    K2 = K @ K
    R = jnp.eye(3, dtype=xi.dtype) + a * K + b * K2
    V = jnp.eye(3, dtype=xi.dtype) + b * K + c * K2
    t = V @ v
    return jnp.eye(4, dtype=xi.dtype).at[:3, :3].set(R).at[:3, 3].set(t)


def se3_inv(T):
    R, t = T[:3, :3], T[:3, 3]
    return jnp.eye(4, dtype=T.dtype).at[:3, :3].set(R.T).at[:3, 3].set(-R.T @ t)


def se3_scale(T, s):
    return T.at[:3, 3].multiply(s)


@functools.partial(jax.jit, static_argnames=("fx", "fy", "cx", "cy", "width"))
def solve_pose(flow, z, w, *, fx, fy, cx, cy, width):
    ab = pose_normal_equations(flow, z, w, fx=fx, fy=fy, cx=cx, cy=cy, width=width)
    A = ab[:6, :6] + 1e-3 * jnp.eye(6, dtype=jnp.float32)
    b = ab[:6, 6]
    xi = jnp.linalg.solve(A, b)
    rel_pose = se3_exp(xi)
    # Convergence guard on-device (no host sync): NaN or large twist -> identity.
    bad = jnp.any(jnp.isnan(xi)) | jnp.any(jnp.abs(xi) > 0.1)
    rel_pose = jnp.where(bad, jnp.eye(4, dtype=jnp.float32), rel_pose)
    return xi, rel_pose


@functools.partial(jax.jit, static_argnames=("inv_scale",))
def update_pose(last_pose, rel_pose, *, inv_scale):
    rel_pose = se3_scale(rel_pose, inv_scale)
    return last_pose @ se3_inv(rel_pose)


# ----------------------------------------------------------------------------
# PoseEstimator
# ----------------------------------------------------------------------------
class PoseEstimator:
    def __init__(self, config, intrinsics, baseline, img_shape):
        self.H, self.W = img_shape
        hid = 32
        # Deterministic synthetic weights (no checkpoint load).
        k1, k2, k3 = jax.random.split(jax.random.PRNGKey(0), 3)
        w1 = 0.1 * jax.random.normal(k1, (hid, 6), jnp.float32)
        w2 = 0.1 * jax.random.normal(k2, (2, hid), jnp.float32)
        w3 = 0.1 * jax.random.normal(k3, (1, hid), jnp.float32)
        # Split first layer per image (no 6xP concat) and fuse flow + conf heads.
        self.params = dict(
            w1a=w1[:, :3], w1b=w1[:, 3:],
            b1=jnp.zeros((hid, 1), jnp.float32),
            w23=jnp.concatenate([w2, w3], axis=0),
            b23=jnp.zeros((3, 1), jnp.float32),
        )
        intr = jnp.asarray(intrinsics, jnp.float32)
        self.fx = float(intr[0, 0])
        self.fy = float(intr[1, 1])
        self.cx = float(intr[0, 2])
        self.cy = float(intr[1, 2])
        self.scale = 1.0 / float(config["depth_clipping"][1])
        self.dmin_scaled = float(config["depth_clipping"][0]) * self.scale
        self.baseline = float(baseline)
        self.last_pose = jnp.eye(4, dtype=jnp.float32)
        self.config = config
        self.frame2frame = config["frame2frame"]
        self.last_frame = None
        self.frame = None
        self.scene = None  # TODO(synk): SurfelMap scene model / f2m render path has no clean Pallas equivalent.

    def _flatten(self, img):
        # (1,3,H,W) -> channel-major (3, H*W); bf16 stream, f32 math in-kernel.
        return (img.reshape(3, self.H * self.W) / 255.0).astype(jnp.bfloat16)

    def forward(self, limg, rimg, mask):
        H, W = self.H, self.W
        P = H * W
        l_flat = self._flatten(limg.astype(jnp.float32))
        r_flat = self._flatten(rimg.astype(jnp.float32))
        mask_flat = mask.reshape(1, P).astype(jnp.float32)

        self.last_frame = self.frame
        frame = {"img": l_flat, "rimg": r_flat}
        self.frame = frame

        # ONE fused flow-net launch per frame: stereo fwd/bwd (+ temporal fwd/bwd).
        if self.last_frame is None:
            img_a = jnp.stack([l_flat, r_flat])
            img_b = jnp.stack([r_flat, l_flat])
        else:
            last_l = self.last_frame["img"]
            img_a = jnp.stack([l_flat, r_flat, last_l, l_flat])
            img_b = jnp.stack([r_flat, l_flat, l_flat, last_l])
        packed = flow_net_batched(img_a, img_b, self.params,
                                  baseline_scaled=self.baseline * self.scale,
                                  dmin_scaled=self.dmin_scaled)

        stereo_flow = packed[0, 0:2]
        depth_s = packed[0, 3:4]       # scaled depth
        valid = packed[0, 4:5]
        depth_r_s = packed[1, 3:4]
        valid_r = packed[1, 4:5]

        frame["flow"] = stereo_flow
        frame["depth_scaled"] = depth_s
        frame["depth"] = depth_s / self.scale
        frame["mask"] = mask_flat * valid

        flow = None
        flow_bwd = None
        weights = None
        rel_pose = jnp.eye(4, dtype=jnp.float32)

        if self.last_frame is not None:
            flow = packed[2, 0:2]
            conf = packed[2, 2:3]
            flow_bwd = packed[3, 0:2]
            weights = conf if self.config["conf_weighing"] else jnp.ones_like(conf)
            # Single weighted Gauss-Newton step (stands in for the LBFGS/declarative layer).
            z = self.last_frame["depth_scaled"]
            w = weights * self.last_frame["mask"]
            _, rel_pose = solve_pose(flow, z, w, fx=self.fx, fy=self.fy,
                                     cx=self.cx, cy=self.cy, width=W)

        self.last_pose = update_pose(self.last_pose, rel_pose,
                                     inv_scale=1.0 / self.scale)
        # TODO(synk): scene.fuse (SurfelMap fusion) omitted; self.scene stays None.

        def to_img(a, c):
            return None if a is None else a.reshape(1, c, H, W)

        return (self.last_pose, self.scene, to_img(flow, 2), to_img(weights, 1),
                to_img(frame["depth"], 1), to_img(flow_bwd, 2), to_img(valid, 1),
                to_img(depth_r_s / self.scale, 1), to_img(valid_r, 1))


if __name__ == "__main__":
    H = W = 16
    key = jax.random.PRNGKey(0)
    k1, k2, k3, k4 = jax.random.split(key, 4)
    limg1 = jax.random.uniform(k1, (1, 3, H, W), jnp.float32, 0.0, 255.0)
    rimg1 = jax.random.uniform(k2, (1, 3, H, W), jnp.float32, 0.0, 255.0)
    limg2 = jax.random.uniform(k3, (1, 3, H, W), jnp.float32, 0.0, 255.0)
    rimg2 = jax.random.uniform(k4, (1, 3, H, W), jnp.float32, 0.0, 255.0)
    mask = jnp.ones((1, 1, H, W), dtype=jnp.bool_)

    fx = fy = 20.0
    intrinsics = jnp.array([[fx, 0.0, W / 2.0],
                            [0.0, fy, H / 2.0],
                            [0.0, 0.0, 1.0]], jnp.float32)
    config = dict(depth_clipping=(0.1, 100.0), frame2frame=True, conf_weighing=True,
                  lbgfs_iters=1, dist_thr=0.1, average_pts=False)

    est = PoseEstimator(config, intrinsics, baseline=4.0, img_shape=(H, W))

    out1 = est.forward(limg1, rimg1, mask)   # first frame: stereo-only init path
    out2 = est.forward(limg2, rimg2, mask)   # second frame: frame-to-frame pose path

    pose = jax.block_until_ready(out2[0])
    for item in out2:
        if item is not None and hasattr(item, "block_until_ready"):
            item.block_until_ready()

    assert pose.shape == (4, 4)
    assert not bool(jnp.any(jnp.isnan(pose)))
    print("KERNEL_OK")
</pallas_src>

<mosaic_0001>
module attributes {stable_mosaic.version = 11 : i64} {
  func.func @_flow_net_kernel(%arg0: i32, %arg1: i32, %arg2: memref<1x3x256xbf16, #tpu.memory_space<vmem>>, %arg3: memref<1x3x256xbf16, #tpu.memory_space<vmem>>, %arg4: memref<32x3xf32, #tpu.memory_space<vmem>>, %arg5: memref<32x3xf32, #tpu.memory_space<vmem>>, %arg6: memref<32x1xf32, #tpu.memory_space<vmem>>, %arg7: memref<3x32xf32, #tpu.memory_space<vmem>>, %arg8: memref<3x1xf32, #tpu.memory_space<vmem>>, %arg9: memref<1x8x256xf32, #tpu.memory_space<vmem>>) attributes {dimension_semantics = [#tpu.dimension_semantics<parallel>, #tpu.dimension_semantics<parallel>], iteration_bounds = array<i64: 2, 1>, scalar_prefetch = 0 : i64, scratch_operands = 0 : i64, tpu.core_type = #tpu.core_type<tc>, window_params = [{transform_indices = @transform_0, window_bounds = array<i64: 1, 3, 256>}, {transform_indices = @transform_1, window_bounds = array<i64: 1, 3, 256>}, {pipeline_mode = #tpu.pipeline_mode<synchronous>, transform_indices = @transform_2, window_bounds = array<i64: 32, 3>}, {pipeline_mode = #tpu.pipeline_mode<synchronous>, transform_indices = @transform_3, window_bounds = array<i64: 32, 3>}, {pipeline_mode = #tpu.pipeline_mode<synchronous>, transform_indices = @transform_4, window_bounds = array<i64: 32, 1>}, {pipeline_mode = #tpu.pipeline_mode<synchronous>, transform_indices = @transform_5, window_bounds = array<i64: 3, 32>}, {pipeline_mode = #tpu.pipeline_mode<synchronous>, transform_indices = @transform_6, window_bounds = array<i64: 3, 1>}, {transform_indices = @transform_7, window_bounds = array<i64: 1, 8, 256>}]} {
    %c0 = arith.constant 0 : index
    %c0_0 = arith.constant 0 : index
    %c0_1 = arith.constant 0 : index
    %0 = vector.load %arg2[%c0, %c0_0, %c0_1] : memref<1x3x256xbf16, #tpu.memory_space<vmem>>, vector<1x3x256xbf16>
    %1 = vector.shape_cast %0 : vector<1x3x256xbf16> to vector<3x256xbf16>
    %2 = arith.extf %1 : vector<3x256xbf16> to vector<3x256xf32>
    %c0_2 = arith.constant 0 : index
    %c0_3 = arith.constant 0 : index
    %c0_4 = arith.constant 0 : index
    %3 = vector.load %arg3[%c0_2, %c0_3, %c0_4] : memref<1x3x256xbf16, #tpu.memory_space<vmem>>, vector<1x3x256xbf16>
    %4 = vector.shape_cast %3 : vector<1x3x256xbf16> to vector<3x256xbf16>
    %5 = arith.extf %4 : vector<3x256xbf16> to vector<3x256xf32>
    %c0_5 = arith.constant 0 : index
    %c0_6 = arith.constant 0 : index
    %6 = vector.load %arg4[%c0_5, %c0_6] : memref<32x3xf32, #tpu.memory_space<vmem>>, vector<32x3xf32>
    %cst = arith.constant dense<0.000000e+00> : vector<32x256xf32>
    %7 = tpu.matmul %6, %2, %cst {dimension_numbers = #tpu.dot_dimension_numbers<[1], [0], [0], [1], [0, 0, 1, 1], [], []>} : vector<32x3xf32>, vector<3x256xf32>, vector<32x256xf32> -> vector<32x256xf32>
    %c0_7 = arith.constant 0 : index
    %c0_8 = arith.constant 0 : index
    %8 = vector.load %arg5[%c0_7, %c0_8] : memref<32x3xf32, #tpu.memory_space<vmem>>, vector<32x3xf32>
    %cst_9 = arith.constant dense<0.000000e+00> : vector<32x256xf32>
    %9 = tpu.matmul %8, %5, %cst_9 {dimension_numbers = #tpu.dot_dimension_numbers<[1], [0], [0], [1], [0, 0, 1, 1], [], []>} : vector<32x3xf32>, vector<3x256xf32>, vector<32x256xf32> -> vector<32x256xf32>
    %10 = arith.addf %7, %9 : vector<32x256xf32>
    %c0_10 = arith.constant 0 : index
    %c0_11 = arith.constant 0 : index
    %11 = vector.load %arg6[%c0_10, %c0_11] : memref<32x1xf32, #tpu.memory_space<vmem>>, vector<32x1xf32>
    %12 = vector.broadcast %11 : vector<32x1xf32> to vector<32x256xf32>
    %13 = arith.addf %10, %12 : vector<32x256xf32>
    %cst_12 = arith.constant 0.000000e+00 : f32
    %14 = vector.broadcast %cst_12 : f32 to vector<32x256xf32>
    %15 = arith.maximumf %13, %14 : vector<32x256xf32>
    %c0_13 = arith.constant 0 : index
    %c0_14 = arith.constant 0 : index
    %16 = vector.load %arg7[%c0_13, %c0_14] : memref<3x32xf32, #tpu.memory_space<vmem>>, vector<3x32xf32>
    %cst_15 = arith.constant dense<0.000000e+00> : vector<3x256xf32>
    %17 = tpu.matmul %16, %15, %cst_15 {dimension_numbers = #tpu.dot_dimension_numbers<[1], [0], [0], [1], [0, 0, 1, 1], [], []>} : vector<3x32xf32>, vector<32x256xf32>, vector<3x256xf32> -> vector<3x256xf32>
    %c0_16 = arith.constant 0 : index
    %c0_17 = arith.constant 0 : index
    %18 = vector.load %arg8[%c0_16, %c0_17] : memref<3x1xf32, #tpu.memory_space<vmem>>, vector<3x1xf32>
    %19 = vector.broadcast %18 : vector<3x1xf32> to vector<3x256xf32>
    %20 = arith.addf %17, %19 : vector<3x256xf32>
    %21 = vector.extract_strided_slice %20 {offsets = [0, 0], sizes = [2, 256], strides = [1, 1]} : vector<3x256xf32> to vector<2x256xf32>
    %22 = vector.extract_strided_slice %20 {offsets = [2, 0], sizes = [1, 256], strides = [1, 1]} : vector<3x256xf32> to vector<1x256xf32>
    %23 = arith.negf %22 : vector<1x256xf32>
    %24 = math.exp %23 : vector<1x256xf32>
    %cst_18 = arith.constant 1.000000e+00 : f32
    %25 = vector.broadcast %cst_18 : f32 to vector<1x256xf32>
    %26 = arith.addf %25, %24 : vector<1x256xf32>
    %27 = arith.divf %25, %26 : vector<1x256xf32>
    %28 = vector.extract_strided_slice %20 {offsets = [0, 0], sizes = [1, 256], strides = [1, 1]} : vector<3x256xf32> to vector<1x256xf32>
    %29 = math.absf %28 : vector<1x256xf32>
    %cst_19 = arith.constant 0.00999999977 : f32
    %30 = vector.broadcast %cst_19 : f32 to vector<1x256xf32>
    %31 = arith.addf %29, %30 : vector<1x256xf32>
    %cst_20 = arith.constant 4.000000e-02 : f32
    %32 = vector.broadcast %cst_20 : f32 to vector<1x256xf32>
    %33 = arith.divf %32, %31 : vector<1x256xf32>
    %cst_21 = arith.constant 1.000000e-03 : f32
    %34 = vector.broadcast %cst_21 : f32 to vector<1x256xf32>
    %35 = arith.cmpf oge, %33, %34 : vector<1x256xf32>
    %cst_22 = arith.constant 1.000000e+00 : f32
    %36 = vector.broadcast %cst_22 : f32 to vector<1x256xf32>
    %37 = arith.cmpf ole, %33, %36 : vector<1x256xf32>
    %38 = arith.andi %35, %37 : vector<1x256xi1>
    %cst_23 = arith.constant 1.000000e+00 : f32
    %cst_24 = arith.constant 0.000000e+00 : f32
    %39 = vector.broadcast %cst_23 : f32 to vector<1x256xf32>
    %40 = vector.broadcast %cst_24 : f32 to vector<1x256xf32>
    %41 = arith.select %38, %39, %40 : vector<1x256xi1>, vector<1x256xf32>
    %cst_25 = arith.constant 0.000000e+00 : f32
    %42 = vector.broadcast %cst_25 : f32 to vector<3x256xf32>
    %43 = tpu.concatenate %21, %27, %33, %41, %42 in 0 : vector<2x256xf32>, vector<1x256xf32>, vector<1x256xf32>, vector<1x256xf32>, vector<3x256xf32> -> vector<8x256xf32>
    %c0_26 = arith.constant 0 : index
    %c0_27 = arith.constant 0 : index
    %c0_28 = arith.constant 0 : index
    %44 = vector.load %arg9[%c0_26, %c0_27, %c0_28] : memref<1x8x256xf32, #tpu.memory_space<vmem>>, vector<1x8x256xf32>
    %45 = vector.shape_cast %44 : vector<1x8x256xf32> to vector<8x256xf32>
    %46 = vector.shape_cast %43 : vector<8x256xf32> to vector<1x8x256xf32>
    tpu.vector_store %arg9[%c0_26, %c0_27, %c0_28], %46 {strides = array<i32>} : memref<1x8x256xf32, #tpu.memory_space<vmem>>, vector<1x8x256xf32>,
    return
  }
  func.func @transform_0(%arg0: i32, %arg1: i32) -> (i32, i32, i32) {
    %c0_i32 = arith.constant 0 : i32
    %c0_i32_0 = arith.constant 0 : i32
    return %arg0, %c0_i32, %arg1 : i32, i32, i32
  }
  func.func @transform_1(%arg0: i32, %arg1: i32) -> (i32, i32, i32) {
    %c0_i32 = arith.constant 0 : i32
    %c0_i32_0 = arith.constant 0 : i32
    return %arg0, %c0_i32, %arg1 : i32, i32, i32
  }
  func.func @transform_2(%arg0: i32, %arg1: i32) -> (i32, i32) {
    %c0_i32 = arith.constant 0 : i32
    %c0_i32_0 = arith.constant 0 : i32
    %c0_i32_1 = arith.constant 0 : i32
    return %c0_i32, %c0_i32_0 : i32, i32
  }
  func.func @transform_3(%arg0: i32, %arg1: i32) -> (i32, i32) {
    %c0_i32 = arith.constant 0 : i32
    %c0_i32_0 = arith.constant 0 : i32
    %c0_i32_1 = arith.constant 0 : i32
    return %c0_i32, %c0_i32_0 : i32, i32
  }
  func.func @transform_4(%arg0: i32, %arg1: i32) -> (i32, i32) {
    %c0_i32 = arith.constant 0 : i32
    %c0_i32_0 = arith.constant 0 : i32
    %c0_i32_1 = arith.constant 0 : i32
    return %c0_i32, %c0_i32_0 : i32, i32
  }
  func.func @transform_5(%arg0: i32, %arg1: i32) -> (i32, i32) {
    %c0_i32 = arith.constant 0 : i32
    %c0_i32_0 = arith.constant 0 : i32
    %c0_i32_1 = arith.constant 0 : i32
    return %c0_i32, %c0_i32_0 : i32, i32
  }
  func.func @transform_6(%arg0: i32, %arg1: i32) -> (i32, i32) {
    %c0_i32 = arith.constant 0 : i32
    %c0_i32_0 = arith.constant 0 : i32
    %c0_i32_1 = arith.constant 0 : i32
    return %c0_i32, %c0_i32_0 : i32, i32
  }
  func.func @transform_7(%arg0: i32, %arg1: i32) -> (i32, i32, i32) {
    %c0_i32 = arith.constant 0 : i32
    %c0_i32_0 = arith.constant 0 : i32
    return %arg0, %c0_i32, %arg1 : i32, i32, i32
  }
}

</mosaic_0001>

<bundles_post_ra>
// kernel: flow_net_batched.1
= control target key start
LH: loop header
LB: loop body
LE: loop exit
PB: predicated region body
PF: predicated region fallthrough
CT: control target
= control target key end

     0   :  { %12 = vsyncpa [#allocation3], 0  ;;  %s1268_s0 = inlined_call_operand.vmem [shape: bf16[2,3,256], index: 0, kind: input, shape index: {}]   ;;  %s1269_s1 = inlined_call_operand.vmem [shape: bf16[2,3,256], index: 1, kind: input, shape index: {}]   ;;  %s1270_s2 = inlined_call_operand.vmem [shape: f32[32,3], index: 2, kind: input, shape index: {}]   ;;  %s1271_s3 = inlined_call_operand.vmem [shape: f32[32,3], index: 3, kind: input, shape index: {}]   ;;  %s1272_s4 = inlined_call_operand.vmem [shape: f32[32,1], index: 4, kind: input, shape index: {}]   ;;  %s1273_s5 = inlined_call_operand.vmem [shape: f32[3,32], index: 5, kind: input, shape index: {}]   ;;  %s1274_s6 = inlined_call_operand.vmem [shape: f32[3,1], index: 6, kind: input, shape index: {}]   ;;  %s1275_s7 = inlined_call_operand.hbm [shape: f32[2,8,256], index: 7, kind: output, shape index: {}]  }
   0x1   :  { %14 = vsyncpa [#allocation3 + $0x1], 0  ;;  %s1083_s24 = smov 0   ;;  %s1085_s25 = smov 0  }
   0x2   :  { %s1087_s26 = smov 0   ;;  %s1089_s27 = smov 0  }
   0x3   :  { %s1091_s28 = smov 0   ;;  %s1093_s29 = smov 0  }
   0x4 LB: > { %s858_s30 = sadd.s32 4294967295, %s1038_s29   ;;  %s859_s8 = sadd.s32 4294967294, %s1038_s29   ;;  %s1038_s29 = sphi %s1093_s29, %s20_s29   ;;  %s1034_s28 = sphi %s1091_s28, %s1285_s28   ;;  %s1030_s27 = sphi %s1089_s27, %s1284_s27   ;;  %s1026_s26 = sphi %s1087_s26, %s1283_s26   ;;  %s1022_s25 = sphi %s1085_s25, %s1282_s25   ;;  %s1018_s24 = sphi %s1083_s24, %s1281_s24  }
   0x5   : > { %s32_s9 = sadd.s32 1, %s1034_s28  ;;  %s202_s10 = sadd.s32 1, %s1026_s26 }
   0x6   : > { %p34_p0 = scmp.ge.s32.totalorder %s32_s9, 2  ;;  %p212_p1 = scmp.ne.s32.totalorder %s1026_s26, %s1022_s25 }
   0x7   : > { %p213_p2 = scmp.eq.s32.totalorder %s858_s30, 1  ;;  %p218_p3 = scmp.ne.s32.totalorder %s1022_s25, %s1018_s24 }
   0x8   : > { %s1287_s9 = smov (%p34_p0, %s32_s9), 0  ;;  %p219_p5 = scmp.eq.s32.totalorder %s859_s8, 1 }
   0x9   : > { %1277 = sst [smem:[#allocation5_spill]] %s1287_s9  ;;  %p1123_p4 = por %p213_p2, %p212_p1 }
   0xa   : > { %s197_s12 = ssub.s32 %s1034_s28, %s1287_s9  ;;  %p862_p6 = scmp.ge.s32.totalorder %s1038_s29, 1 }
   0xb   : > { %p200_p7 = scmp.eq.s32.totalorder %s197_s12, 0  ;;  %p1130_p8 = por %p219_p5, %p218_p3 }
   0xc   : > { %p278_p9 = scmp.lt.s32.totalorder %s1038_s29, 3 }
   0xd   : > { %s1136_s14 = scalar_select %p200_p7, %s1026_s26, %s202_s10  }
   0xe   : > { %p279_p10 = pnand %p862_p6, %p278_p9 }
   0xf   : > { %p324_p11 = scmp.lt.s32.totalorder (!%p279_p10), %s1030_s27, 1  ;;  %s320_s22 = sand.u32 (!%p279_p10), 1, %s1022_s25  }
  0x10   : > { %282 = sbr.rel (%p279_p10) target bundleno = 501 (0x1f5), region = 48  ;;  %s890_s30 = sshll.u32 (!%p279_p10), %s1030_s27, 8 }
  0x11   : > { %s1225_s17 = scalar_lea.hbm (!%p279_p10), %s1275_s7, %s890_s30  ;;  %s1042_s18 = smov (!%p279_p10), [#allocation2]  }
  0x12   : > { %s966_s9 = sshll.u32 (!%p279_p10), %s1042_s18, 4  ;;  %s967_s9 = int_to_ptr.vmem [resolvable:$false] %s966_s9 }
  0x13   : > { %s968_s19 = scalar_lea.vmem (!%p279_p10), %s967_s9, 512 }
  0x15   : > { %v1040_v0 = vmov 0.0   ;;  %s325_s15 = scalar_select %p324_p11, %s1030_s27, 1  ;;  %v1041_v1 = vmov 0   ;;  %v573_v2 = vld [vmem:[%s1272_s4 + $0x8] sm:$0xff]  ;;  %v575_v3 = vld [vmem:[%s1272_s4 + $0x18] sm:$0xff]  ;;  %v572_v4 = vld [vmem:[%s1272_s4] sm:$0xff] }
  0x16   : > { %440 = vmatprep.mubr.f32.mxu0 %v1040_v0  ;;  %547 = vmatprep.mubr.f32.mxu1 %v1040_v0  ;;  %v574_v5 = vld [vmem:[%s1272_s4 + $0x10] sm:$0xff]  ;;  %vm371_vm0 = vcmask 1042432   ;;  %v352_v12 = vld [vmem:[%s1271_s3] sm:$0xff]  ;;  %vm358_vm1 = vcmask 23552   ;;  %v353_v15 = vld [vmem:[%s1271_s3 + $0x8] sm:$0xff]  ;;  %vm619_vm2 = vcmask 261120  }
  0x17   : > { %949 = vset.pattern.permute.xlu1 %v1041_v1  ;;  %948 = vset.pattern.permute.xlu0 %v1041_v1  ;;  %s888_s20 = sshll.u32 %s325_s15, 2  ;;  %v348_v13 = vld [vmem:[%s1270_s2] sm:$0xff]  ;;  %v349_v16 = vld [vmem:[%s1270_s2 + $0x8] sm:$0xff]  ;;  %v354_v17 = vld [vmem:[%s1271_s3 + $0x10] sm:$0xff]  ;;  %vm734_vm8 = vcmask 1041408   ;;  %vm739_vm10 = vcmask 1043456  }
  0x18   : > { %583 = vperm.xlu1 %949, %v573_v2   ;;  %593 = vperm.xlu0 %948, %v575_v3   ;;  %s341_s23 = scalar_lea.vmem %s1269_s1, %s888_s20  ;;  %s331_s10 = scalar_lea.vmem %s1268_s0, %s888_s20  ;;  %v613_v14 = vld [vmem:[%s1274_s6] sm:$0x7]  ;;  %v350_v18 = vld [vmem:[%s1270_s2 + $0x10] sm:$0xff]  ;;  %v355_v19 = vld [vmem:[%s1271_s3 + $0x18] sm:$0xff]  ;;  %vm742_vm11 = vcmask 1044480  }
  0x19   : > { %v346_v6 = vld [vmem:[%s341_s23] sm:$0xf]  ;;  %v351_v20 = vld [vmem:[%s1270_s2 + $0x18] sm:$0xff]  ;;  %s863_s23 = sshll.u32 %s320_s22, 4  ;;  %s748_s27 = scalar_lea.sflag [#allocation3], %s320_s22 }
  0x1a   : > { %v344_v7 = vld [vmem:[%s331_s10] sm:$0xf]  ;;  %v347_v8 = vunpack.c.l.bf16 %v346_v6  ;;  %s322_s8 = scalar_lea.vmem [#allocation2], %s863_s23 }
  0x1b   : > { %v345_v9 = vunpack.c.l.bf16 %v344_v7  ;;  %v612_v2 = vld [vmem:[%s1273_s5] sm:$0x7]  ;;  %s764_s10 = sshll.u32 %s322_s8, 4  ;;  %s765_s10 = int_to_ptr.vmem [resolvable:$true] %s764_s10 }
  0x1c   : > { %578 = vperm.xlu1 %949, %v572_v4   ;;  %588 = vperm.xlu0 %948, %v574_v5   ;;  %v357_v10 = vcombine.high %v347_v8, %v347_v8  ;;  %s962_s15 = scalar_lea.vmem %s765_s10, 256  ;;  %p969_p1 = scmp.lt.s32.totalorder %s765_s10, %s967_s9 }
  0x1d   : > { %v466_v11 = vcombine.high %v345_v9, %v345_v9  ;;  %p963_p12 = scmp.ne.s32.totalorder %s765_s10, %s962_s15  ;;  %p970_p2 = scmp.lt.s32.totalorder %s968_s19, %s962_s15 }
  0x1e   : > { %868 = vmatprep.subr.msk.mxu0 %vm371_vm0, %v357_v10 }
  0x1f   : > { %874 = vmatprep.subr.msk.mxu1 %vm371_vm0, %v466_v11  ;;  %869 = vmatpush1.msk.msra.mxu0 %vm371_vm0, %v347_v8  ;;  %p964_p13 = pnand %p963_p12, %p1123_p4  ;;  %p971_p3 = por %p970_p2, %p969_p1 }
  0x20   : > { %875 = vmatpush1.msk.msra.mxu1 %vm371_vm0, %v345_v9  ;;  %870 = vmatmul.mubr.msk.f32.vlgmr.msra.gmra.mxu0 %vm358_vm1, %v352_v12 }
  0x21   : > { %876 = vmatmul.mubr.msk.f32.vlgmr.msra.gmra.mxu1 %vm358_vm1, %v348_v13  ;;  %446 = vmatprep.mubr.f32.mxu0 %v1040_v0  ;;  %p965_p0 = pneg %p964_p13 }
  0x22   : > { %553 = vmatprep.mubr.f32.mxu1 %v1040_v0  ;;  %616 = vperm.xlu0 %948, %v613_v14  }
  0x23   : > { %p972_p5 = pnand %p971_p3, %p965_p0 }
  0x24   : > { %871 = vmatmul.mubr.msk.f32.gmra.mxu0 %vm358_vm1, %v353_v15 }
  0x25   : > { %877 = vmatmul.mubr.msk.f32.gmra.mxu1 %vm358_vm1, %v349_v16  ;;  %452 = vmatprep.mubr.f32.mxu0 %v1040_v0 }
  0x26   : > { %559 = vmatprep.mubr.f32.mxu1 %v1040_v0 }
  0x28   : > { %872 = vmatmul.mubr.msk.f32.gmra.mxu0 %vm358_vm1, %v354_v17 }
  0x29   : > { %878 = vmatmul.mubr.msk.f32.gmra.mxu1 %vm358_vm1, %v350_v18  ;;  %458 = vmatprep.mubr.f32.mxu0 %v1040_v0 }
  0x2a   : > { %565 = vmatprep.mubr.f32.mxu1 %v1040_v0 }
  0x2c   : > { %873 = vmatmul.mubr.msk.f32.gmra.mxu0 %vm358_vm1, %v355_v19 }
  0x2d   : > { %879 = vmatmul.mubr.msk.f32.gmra.mxu1 %vm358_vm1, %v351_v20  ;;  %687 = vmatprep.mubr.f32.mxu0 %v1040_v0 }
  0x93   : > { %v594_v31 = vpop.permute.xlu0 %593  ;;  %v584_v36 = vpop.permute.xlu1 %583 }
  0x97   : > { %v589_v43 = vpop.permute.xlu0 %588  ;;  %v579_v52 = vpop.permute.xlu1 %578 }
  0x9d   : > { %v617_v3 = vpop.permute.xlu0 %616 }
  0xe0   : > { %v442_v21 = vpop.f32.mrf.mxu0 }
  0xe1   : > { %v549_v22 = vpop.f32.mrf.mxu1 }
  0xe2   : > { %v444_v23 = vpop.f32.mrf.mxu0  ;;  %v550_v50 = vadd.f32 %v549_v22, %v442_v21 }
  0xe3   : > { %v551_v24 = vpop.f32.mrf.mxu1 }
  0xe4   : > { %v448_v25 = vpop.f32.mrf.mxu0  ;;  %v552_v47 = vadd.f32 %v551_v24, %v444_v23  ;;  %v596_v59 = vadd.f32 %v579_v52, %v550_v50 }
  0xe5   : > { %v555_v26 = vpop.f32.mrf.mxu1 }
  0xe6   : > { %v450_v27 = vpop.f32.mrf.mxu0  ;;  %v556_v45 = vadd.f32 %v555_v26, %v448_v25  ;;  %v597_v57 = vadd.f32 %v579_v52, %v552_v47  ;;  %v604_v1 = vmax.f32 %v596_v59, 0.0 }
  0xe7   : > { %v557_v28 = vpop.f32.mrf.mxu1 }
  0xe8   : > { %v454_v29 = vpop.f32.mrf.mxu0  ;;  %v558_v42 = vadd.f32 %v557_v28, %v450_v27  ;;  %v598_v55 = vadd.f32 %v584_v36, %v556_v45  ;;  %v605_v63 = vmax.f32 %v597_v57, 0.0 }
  0xe9   : > { %v561_v30 = vpop.f32.mrf.mxu1 }
  0xea   : > { %v456_v32 = vpop.f32.mrf.mxu0  ;;  %v562_v39 = vadd.f32 %v561_v30, %v454_v29  ;;  %v599_v53 = vadd.f32 %v584_v36, %v558_v42  ;;  %v606_v62 = vmax.f32 %v598_v55, 0.0 }
  0xeb   : > { %v563_v33 = vpop.f32.mrf.mxu1 }
  0xec   : > { %v460_v34 = vpop.f32.mrf.mxu0  ;;  %v564_v37 = vadd.f32 %v563_v33, %v456_v32  ;;  %v600_v51 = vadd.f32 %v589_v43, %v562_v39  ;;  %v607_v61 = vmax.f32 %v599_v53, 0.0 }
  0xed   : > { %v567_v35 = vpop.f32.mrf.mxu1 }
  0xee   : > { %v568_v38 = vadd.f32 %v567_v35, %v460_v34  ;;  %v462_v40 = vpop.f32.mrf.mxu0  ;;  %v601_v48 = vadd.f32 %v589_v43, %v564_v37  ;;  %v608_v60 = vmax.f32 %v600_v51, 0.0 }
  0xef   : > { %v569_v41 = vpop.f32.mrf.mxu1 }
  0xf0   : > { %v570_v44 = vadd.f32 %v569_v41, %v462_v40  ;;  %v602_v46 = vadd.f32 %v594_v31, %v568_v38  ;;  %v609_v58 = vmax.f32 %v601_v48, 0.0 }
  0xf2   : > { %v603_v49 = vadd.f32 %v594_v31, %v570_v44  ;;  %v610_v56 = vmax.f32 %v602_v46, 0.0 }
  0xf4   : > { %v611_v54 = vmax.f32 %v603_v49, 0.0 }
  0xf6   : > { %647 = vmatprep.subr.mxu0 %v611_v54 }
  0xf7   : > { %648 = vmatpush1.msra.mxu0 %v610_v56 }
  0xf8   : > { %649 = vmatprep.subr.mxu0 %v609_v58 }
  0xf9   : > { %650 = vmatpush1.msra.mxu0 %v608_v60 }
  0xfa   : > { %651 = vmatprep.subr.mxu0 %v607_v61 }
  0xfb   : > { %652 = vmatpush1.msra.mxu0 %v606_v62 }
  0xfc   : > { %653 = vmatprep.subr.mxu0 %v605_v63 }
  0xfd   : > { %654 = vmatpush1.msra.mxu0 %v604_v1 }
  0xfe   : > { %880 = vmatmul.mubr.msk.f32.vlgmr.msra.gmra.mxu0 %vm619_vm2, %v612_v2 }
 0x1be   : > { %v689_v4 = vpop.f32.mrf.mxu0 }
 0x1bf   : > { %v690_v5 = vadd.f32 %v689_v4, %v617_v3 }
 0x1c0   : > { %v691_v6 = vpop.f32.mrf.mxu0 }
 0x1c1   : > { %v881_v7 = vmul.f32 -1.442695, %v690_v5  ;;  %v706_v8 = vand.u32 2147483647, %v690_v5  ;;  %v692_v9 = vadd.f32 %v691_v6, %v617_v3 }
 0x1c3   : > { %950 = vpow2.f32 %v881_v7  ;;  %v708_v10 = vadd.f32 0.01, %v706_v8  ;;  %v882_v11 = vmul.f32 -1.442695, %v692_v9  ;;  %v707_v12 = vand.u32 2147483647, %v692_v9 }
 0x1c5   : > { %952 = vrcp.f32 %v708_v10  ;;  %v709_v13 = vadd.f32 0.01, %v707_v12 }
 0x1c6   : > { %954 = vpow2.f32 %v882_v11 }
 0x1c7   : > { %956 = vrcp.f32 %v709_v13 }
 0x1d0   : > { %v951_v14 = vpop.eup %950 }
 0x1d1   : > { %v700_v15 = vadd.f32 1.0, %v951_v14 }
 0x1d2   : > { %v953_v16 = vpop.eup %952 }
 0x1d3   : > { %v955_v17 = vpop.eup %954  ;;  %958 = vrcp.f32 %v700_v15  ;;  %v711_v19 = vmul.f32 0.04, %v953_v16 }
 0x1d4   : > { %v957_v18 = vpop.eup %956  ;;  %v701_v20 = vadd.f32 1.0, %v955_v17 }
 0x1d5   : > { %v713_v21 = vmul.f32 0.04, %v957_v18  ;;  %vm714_vm3 = vcmp.ge.f32.partialorder %v711_v19, 0.001  ;;  %vm716_vm4 = vcmp.le.f32.partialorder %v711_v19, 1.0  ;;  %v724_v24 = vrot.slane %v711_v19, 5 }
 0x1d6   : > { %960 = vrcp.f32 %v701_v20  ;;  %vm718_vm7 = vmand %vm714_vm3, %vm716_vm4 }
 0x1d7   : > { %vm715_vm5 = vcmp.ge.f32.partialorder %v713_v21, 0.001  ;;  %vm717_vm6 = vcmp.le.f32.partialorder %v713_v21, 1.0  ;;  %v720_v22 = vsel %vm718_vm7, 1.0, %v1040_v0  ;;  %v725_v30 = vrot.slane %v713_v21, 5 }
 0x1d8   : > { %vm719_vm9 = vmand %vm715_vm5, %vm717_vm6  ;;  %v730_v27 = vrot.slane %v720_v22, 4 }
 0x1d9   : > { %v721_v26 = vsel %vm719_vm9, 1.0, %v1040_v0 }
 0x1da   : > { %v731_v33 = vrot.slane %v721_v26, 4 }
 0x1e0   : > { %v959_v23 = vpop.eup %958 }
 0x1e1   : > { %v735_v25 = vsel %vm734_vm8, %v690_v5, %v959_v23 }
 0x1e2   : > { %v737_v28 = vsel %vm371_vm0, %v735_v25, %v724_v24 }
 0x1e3   : > { %v961_v29 = vpop.eup %960  ;;  %v740_v31 = vsel %vm739_vm10, %v737_v28, %v730_v27 }
 0x1e4   : > { %v736_v32 = vsel %vm734_vm8, %v692_v9, %v961_v29  ;;  %v743_v34 = vsel %vm742_vm11, %v740_v31, 0.0 }
 0x1e5   : > { %v738_v0 = vsel %vm371_vm0, %v736_v32, %v725_v30  ;;  %745 = vst [vmem:[%s322_s8] sm:$0xff] %v743_v34 }
 0x1e6   : > { %v741_v35 = vsel %vm739_vm10, %v738_v0, %v731_v33 }
 0x1e7   : > { %v744_v36 = vsel %vm742_vm11, %v741_v35, 0.0 }
 0x1e8   : > { %746 = vst [vmem:[%s322_s8 + $0x8] sm:$0xff] %v744_v36 }
 0x1e9   : > { %975 = shalt.err (!%p972_p5)
}
 0x1ea   : > { %s976_s20 = scalar_lea.hbm %s1225_s17, 256  ;;  %s980_s23 = scalar_lea.hbm %s1275_s7, 512 }
 0x1eb   : > { %p977_p6 = scmp.ne.s32.totalorder %s1225_s17, %s976_s20  ;;  %p981_p10 = scmp.lt.s32.totalorder %s1225_s17, %s1275_s7 }
 0x1ec   : > { %p982_p11 = scmp.lt.s32.totalorder %s980_s23, %s976_s20 }
 0x1ed   : > { %p978_p7 = pnand %p977_p6, %p1123_p4 }
 0x1ee   : > { %p983_p12 = por %p982_p11, %p981_p10 }
 0x1ef   : > { %p979_p9 = pneg %p978_p7 }
 0x1f1   : > { %p984_p13 = pnand %p983_p12, %p979_p9 }
 0x1f3   : > { %987 = shalt.err (!%p984_p13)
}
 0x1f4   : > { %891 = dma.vmem_to_hbm [thread:$0]  (%p1123_p4), %s765_s10, 256, %s1225_s17, %s748_s27  }
 0x1f5 PF: > { %p897_p0 = scmp.ge.s32.totalorder %s1038_s29, 2  ;;  %s776_s12 = sand.u32 1, %s1018_s24  }
 0x1f6   : > { %s777_s16 = scalar_lea.sflag [#allocation3], %s776_s12 }
 0x1f7   : > { %p894_p1 = pnand %p897_p0, %p1130_p8 }
 0x1f9   : > { %p895_p2 = pneg %p894_p1 }
 0x1fb   : > { %1013 = dma.done.wait (%p895_p2), %s777_s16, 256  }
 0x1fc   : > { %1015 = vsyncadd (%p895_p2), %s777_s16, 4294967040  ;;  %s20_s29 = sadd.s32 1, %s1038_s29   ;;  %s1280_s11 = sld [smem:[#allocation5_spill]] }
 0x1fd   : > { %p17_p3 = scmp.ge.s32.totalorder %s20_s29, 4   ;;  %s1281_s24 = smov %s1022_s25 }
 0x1fe   : > { %s1282_s25 = smov %s1026_s26  ;;  %s1283_s26 = smov %s1136_s14 }
 0x1ff   : > { %s1284_s27 = smov %s1034_s28  ;;  %19 = sbr.rel (!%p17_p3) target bundleno = 4 (0x4), region = 86 }
 0x202   : > { %s1285_s28 = smov %s1280_s11 }
 0x204   :  { %782 = vsyncpa [#allocation3], 1 }
 0x205   :  { %784 = vsyncpa [#allocation3 + $0x1], 1 }

</bundles_post_ra>
